<compile_context>
chip_gen: v7x
topology: tpu7x:2x2x1
jax: 0.10.0
libtpu: 0.0.40
codegen_flags: <defaults>
</compile_context>

<pallas_src>
import jax
import jax.numpy as jnp
from jax.experimental import pallas as pl
from jax.experimental.pallas import tpu as pltpu


def topo_prompt_kernel(e2e_scal_ref, e2a_scal_ref, a_e2e_ref, a_e2a_ref, out_ref):
    # e2e/e2a_scal_ref : (layers,) f32 in SMEM (whole arrays).
    # a_*_ref          : (class_block, F) VMEM tiles (one DMA per grid step,
    #                    reused for every layer below).
    # out_ref          : (class_block, layers*F_pad) lane-dense VMEM tile.
    layers = e2e_scal_ref.shape[0]
    F = a_e2e_ref.shape[1]
    F_pad = out_ref.shape[1] // layers

    # Hoisted loads; cast to f32 in-kernel (inputs may be narrow dtypes).
    a_e2e = a_e2e_ref[...].astype(jnp.float32)
    a_e2a = a_e2a_ref[...].astype(jnp.float32)

    for l in range(layers):  # small, static -> unrolled at trace time
        s_e2e = e2e_scal_ref[l]  # scalar reads from SMEM
        s_e2a = e2a_scal_ref[l]
        # Static 128-aligned start (F_pad % 128 == 0); only the final partial
        # vreg of the F-wide value is a masked tail store. Pad columns
        # [l*F_pad+F, (l+1)*F_pad) stay unwritten and must never be read.
        out_ref[:, l * F_pad : l * F_pad + F] = (
            s_e2e * a_e2e + s_e2a * a_e2a
        ).astype(out_ref.dtype)


def topo_prompt_forward(
    e2e_scal,
    e2a_scal,
    attns_e2e,
    attns_e2a,
    *,
    class_block=None,
    out_dtype=jnp.float32,
    return_padded=False,
):
    """e2e_scal/e2a_scal: (layers, 1, 1, 1) f32 parameters.
    attns_e2e/attns_e2a: (n_class, n_set, T, T) attention-count matrices
    (any dtype; cast to f32 inside the kernel).

    Returns (n_class, layers, n_set, T, T) in `out_dtype`, or the raw
    lane-dense (n_class, layers*F_pad) kernel output if return_padded=True
    (preferred at CLIP scale: skips the un-pad slice pass over the output)."""
    n_class, n_set, T, _ = attns_e2e.shape
    layers = e2e_scal.shape[0]

    F = n_set * T * T                  # flattened trailing (n_set, T, T)
    F_pad = pl.cdiv(F, 128) * 128      # lane-aligned per-layer output stride

    # Classes per grid step. Small problems -> one step over all classes;
    # large problems -> 8 (f32 sublane width; double-buffered working set
    # stays small even on v7x's 64 MiB VMEM). For large n_class on v6e/v7x,
    # 16-32 with a matching vmem_limit amortizes the ~0.35 us/step overhead;
    # keep >= 2 grid steps so v7x can use both TensorCores.
    if class_block is None:
        class_block = n_class if n_class <= 8 else 8
    grid = (pl.cdiv(n_class, class_block),)

    a_e2e = attns_e2e.reshape(n_class, F)
    a_e2a = attns_e2a.reshape(n_class, F)
    e2e_flat = e2e_scal.reshape(layers).astype(jnp.float32)
    e2a_flat = e2a_scal.reshape(layers).astype(jnp.float32)

    in_itemsize = jnp.dtype(a_e2e.dtype).itemsize
    out_itemsize = jnp.dtype(out_dtype).itemsize

    # Scoped-VMEM budget: double-buffered input + output tiles plus headroom,
    # clamped to 48 MiB so it stays under v7x's 64 MiB physical VMEM (v5e/v6e
    # have 128 MiB, so the same clamp is safe everywhere).
    tile_bytes = 2 * (
        2 * class_block * F * in_itemsize              # two input tiles
        + class_block * layers * F_pad * out_itemsize  # one output tile
    )
    vmem_limit = int(min(max(tile_bytes + (4 << 20), 32 << 20), 48 << 20))

    # Pure bandwidth-bound elementwise kernel: tell XLA how many bytes move.
    bytes_accessed = (
        2 * n_class * F * in_itemsize
        + n_class * layers * F_pad * out_itemsize
        + 2 * layers * 4
    )
    cost = pl.CostEstimate(
        flops=3 * n_class * layers * F,
        transcendentals=0,
        bytes_accessed=bytes_accessed,
    )

    out = pl.pallas_call(
        topo_prompt_kernel,
        out_shape=jax.ShapeDtypeStruct((n_class, layers * F_pad), out_dtype),
        grid_spec=pl.GridSpec(
            grid=grid,
            in_specs=[
                # Learned scales: whole (layers,) vectors in SMEM.
                pl.BlockSpec(memory_space=pltpu.MemorySpace.SMEM),
                pl.BlockSpec(memory_space=pltpu.MemorySpace.SMEM),
                # One block of classes per grid step; F is the full-extent
                # last dim, so no input padding is needed.
                pl.BlockSpec((class_block, F), lambda c: (c, 0)),
                pl.BlockSpec((class_block, F), lambda c: (c, 0)),
            ],
            out_specs=pl.BlockSpec((class_block, layers * F_pad), lambda c: (c, 0)),
        ),
        compiler_params=pltpu.CompilerParams(
            dimension_semantics=("parallel",),
            vmem_limit_bytes=vmem_limit,
        ),
        cost_estimate=cost,
    )(e2e_flat, e2a_flat, a_e2e, a_e2a)

    if return_padded:
        # Consume layer l of class c via out[c, l*F_pad : l*F_pad + F].
        return out

    out = out.reshape(n_class, layers, F_pad)
    if F_pad != F:
        # Un-pad slice: one extra pass over the output in XLA; prefer
        # return_padded=True for large (CLIP-scale) problems.
        out = out[:, :, :F]
    return out.reshape(n_class, layers, n_set, T, T)


if __name__ == "__main__":
    # Module hyper-parameters (from __init__), at small synthetic sizes.
    n_set = 5          # self.n_set
    layers = 6         # self.layers
    T = 18             # tokens per prompt (CLIP uses 77; small + non-128-aligned here)
    classnames = ["cat", "dog_breed", "bird"]
    n_class = len(classnames)

    key = jax.random.PRNGKey(0)
    k1, k2, k3, k4 = jax.random.split(key, 4)

    # Parameters: nn.Parameter(torch.zeros(layers,1,1,1)). Zeros would make the
    # output trivially zero, so initialize with small deterministic random
    # values to exercise the kernel (original init is zeros).
    e2e_scal = 0.1 * jax.random.normal(k1, (layers, 1, 1, 1), dtype=jnp.float32)
    e2a_scal = 0.1 * jax.random.normal(k2, (layers, 1, 1, 1), dtype=jnp.float32)

    # TODO(synk): CLIP tokenization + topology-dict relationship extraction is
    # host-side string processing; we build deterministic synthetic integer
    # count attention matrices with the same shape/semantics instead.
    attns_e2e = jax.random.randint(k3, (n_class, n_set, T, T), 0, 3).astype(jnp.float32)
    attns_e2a = jax.random.randint(k4, (n_class, n_set, T, T), 0, 3).astype(jnp.float32)

    out = topo_prompt_forward(e2e_scal, e2a_scal, attns_e2e, attns_e2a)
    out = jax.block_until_ready(out)

    # Pure-JAX reference (matches the PyTorch broadcasting semantics).
    ref = (
        e2e_scal.reshape(1, layers, 1, 1, 1) * attns_e2e[:, None]
        + e2a_scal.reshape(1, layers, 1, 1, 1) * attns_e2a[:, None]
    )
    assert out.shape == (n_class, layers, n_set, T, T)
    assert jnp.allclose(out, ref, atol=1e-6), "mismatch vs reference"

    # Also sanity-check the lane-dense padded output path (valid columns only).
    F = n_set * T * T
    F_pad = pl.cdiv(F, 128) * 128
    out_padded = jax.block_until_ready(
        topo_prompt_forward(e2e_scal, e2a_scal, attns_e2e, attns_e2a, return_padded=True)
    )
    assert out_padded.shape == (n_class, layers * F_pad)
    seg0 = out_padded[:, 0:F].reshape(n_class, n_set, T, T)
    assert jnp.allclose(seg0, ref[:, 0], atol=1e-6), "padded-layout mismatch (layer 0)"

    # Same dict-of-classnames structure the PyTorch forward returns.
    attns = {cn.replace("_", " "): out[i] for i, cn in enumerate(classnames)}
    assert attns["dog breed"].shape == (layers, n_set, T, T)

    print("KERNEL_OK")
</pallas_src>

<mosaic_0001>
module attributes {stable_mosaic.version = 11 : i64} {
  func.func @topo_prompt_kernel(%arg0: i32, %arg1: memref<6xf32, #tpu.memory_space<smem>>, %arg2: memref<6xf32, #tpu.memory_space<smem>>, %arg3: memref<3x1620xf32, #tpu.memory_space<vmem>>, %arg4: memref<3x1620xf32, #tpu.memory_space<vmem>>, %arg5: memref<3x9984xf32, #tpu.memory_space<vmem>>) attributes {dimension_semantics = [#tpu.dimension_semantics<parallel>], iteration_bounds = array<i64: 1>, scalar_prefetch = 0 : i64, scratch_operands = 0 : i64, tpu.core_type = #tpu.core_type<tc>, window_params = [{transform_indices = @transform_0, window_bounds = array<i64: 6>}, {transform_indices = @transform_1, window_bounds = array<i64: 6>}, {transform_indices = @transform_2, window_bounds = array<i64: 3, 1620>}, {transform_indices = @transform_3, window_bounds = array<i64: 3, 1620>}, {transform_indices = @transform_4, window_bounds = array<i64: 3, 9984>}]} {
    %c0 = arith.constant 0 : index
    %c0_0 = arith.constant 0 : index
    %0 = vector.load %arg3[%c0, %c0_0] : memref<3x1620xf32, #tpu.memory_space<vmem>>, vector<3x1620xf32>
    %c0_1 = arith.constant 0 : index
    %c0_2 = arith.constant 0 : index
    %1 = vector.load %arg4[%c0_1, %c0_2] : memref<3x1620xf32, #tpu.memory_space<vmem>>, vector<3x1620xf32>
    %c0_3 = arith.constant 0 : index
    %2 = memref.load %arg1[%c0_3] : memref<6xf32, #tpu.memory_space<smem>>
    %c0_4 = arith.constant 0 : index
    %3 = memref.load %arg2[%c0_4] : memref<6xf32, #tpu.memory_space<smem>>
    %4 = vector.broadcast %2 : f32 to vector<3x1620xf32>
    %5 = arith.mulf %4, %0 : vector<3x1620xf32>
    %6 = vector.broadcast %3 : f32 to vector<3x1620xf32>
    %7 = arith.mulf %6, %1 : vector<3x1620xf32>
    %8 = arith.addf %5, %7 : vector<3x1620xf32>
    %c0_5 = arith.constant 0 : index
    %c0_6 = arith.constant 0 : index
    %9 = vector.load %arg5[%c0_5, %c0_6] : memref<3x9984xf32, #tpu.memory_space<vmem>>, vector<3x1620xf32>
    tpu.vector_store %arg5[%c0_5, %c0_6], %8 {strides = array<i32>} : memref<3x9984xf32, #tpu.memory_space<vmem>>, vector<3x1620xf32>,
    %c1 = arith.constant 1 : index
    %10 = memref.load %arg1[%c1] : memref<6xf32, #tpu.memory_space<smem>>
    %c1_7 = arith.constant 1 : index
    %11 = memref.load %arg2[%c1_7] : memref<6xf32, #tpu.memory_space<smem>>
    %12 = vector.broadcast %10 : f32 to vector<3x1620xf32>
    %13 = arith.mulf %12, %0 : vector<3x1620xf32>
    %14 = vector.broadcast %11 : f32 to vector<3x1620xf32>
    %15 = arith.mulf %14, %1 : vector<3x1620xf32>
    %16 = arith.addf %13, %15 : vector<3x1620xf32>
    %c0_8 = arith.constant 0 : index
    %c1664 = arith.constant 1664 : index
    %17 = vector.load %arg5[%c0_8, %c1664] : memref<3x9984xf32, #tpu.memory_space<vmem>>, vector<3x1620xf32>
    tpu.vector_store %arg5[%c0_8, %c1664], %16 {strides = array<i32>} : memref<3x9984xf32, #tpu.memory_space<vmem>>, vector<3x1620xf32>,
    %c2 = arith.constant 2 : index
    %18 = memref.load %arg1[%c2] : memref<6xf32, #tpu.memory_space<smem>>
    %c2_9 = arith.constant 2 : index
    %19 = memref.load %arg2[%c2_9] : memref<6xf32, #tpu.memory_space<smem>>
    %20 = vector.broadcast %18 : f32 to vector<3x1620xf32>
    %21 = arith.mulf %20, %0 : vector<3x1620xf32>
    %22 = vector.broadcast %19 : f32 to vector<3x1620xf32>
    %23 = arith.mulf %22, %1 : vector<3x1620xf32>
    %24 = arith.addf %21, %23 : vector<3x1620xf32>
    %c0_10 = arith.constant 0 : index
    %c3328 = arith.constant 3328 : index
    %25 = vector.load %arg5[%c0_10, %c3328] : memref<3x9984xf32, #tpu.memory_space<vmem>>, vector<3x1620xf32>
    tpu.vector_store %arg5[%c0_10, %c3328], %24 {strides = array<i32>} : memref<3x9984xf32, #tpu.memory_space<vmem>>, vector<3x1620xf32>,
    %c3 = arith.constant 3 : index
    %26 = memref.load %arg1[%c3] : memref<6xf32, #tpu.memory_space<smem>>
    %c3_11 = arith.constant 3 : index
    %27 = memref.load %arg2[%c3_11] : memref<6xf32, #tpu.memory_space<smem>>
    %28 = vector.broadcast %26 : f32 to vector<3x1620xf32>
    %29 = arith.mulf %28, %0 : vector<3x1620xf32>
    %30 = vector.broadcast %27 : f32 to vector<3x1620xf32>
    %31 = arith.mulf %30, %1 : vector<3x1620xf32>
    %32 = arith.addf %29, %31 : vector<3x1620xf32>
    %c0_12 = arith.constant 0 : index
    %c4992 = arith.constant 4992 : index
    %33 = vector.load %arg5[%c0_12, %c4992] : memref<3x9984xf32, #tpu.memory_space<vmem>>, vector<3x1620xf32>
    tpu.vector_store %arg5[%c0_12, %c4992], %32 {strides = array<i32>} : memref<3x9984xf32, #tpu.memory_space<vmem>>, vector<3x1620xf32>,
    %c4 = arith.constant 4 : index
    %34 = memref.load %arg1[%c4] : memref<6xf32, #tpu.memory_space<smem>>
    %c4_13 = arith.constant 4 : index
    %35 = memref.load %arg2[%c4_13] : memref<6xf32, #tpu.memory_space<smem>>
    %36 = vector.broadcast %34 : f32 to vector<3x1620xf32>
    %37 = arith.mulf %36, %0 : vector<3x1620xf32>
    %38 = vector.broadcast %35 : f32 to vector<3x1620xf32>
    %39 = arith.mulf %38, %1 : vector<3x1620xf32>
    %40 = arith.addf %37, %39 : vector<3x1620xf32>
    %c0_14 = arith.constant 0 : index
    %c6656 = arith.constant 6656 : index
    %41 = vector.load %arg5[%c0_14, %c6656] : memref<3x9984xf32, #tpu.memory_space<vmem>>, vector<3x1620xf32>
    tpu.vector_store %arg5[%c0_14, %c6656], %40 {strides = array<i32>} : memref<3x9984xf32, #tpu.memory_space<vmem>>, vector<3x1620xf32>,
    %c5 = arith.constant 5 : index
    %42 = memref.load %arg1[%c5] : memref<6xf32, #tpu.memory_space<smem>>
    %c5_15 = arith.constant 5 : index
    %43 = memref.load %arg2[%c5_15] : memref<6xf32, #tpu.memory_space<smem>>
    %44 = vector.broadcast %42 : f32 to vector<3x1620xf32>
    %45 = arith.mulf %44, %0 : vector<3x1620xf32>
    %46 = vector.broadcast %43 : f32 to vector<3x1620xf32>
    %47 = arith.mulf %46, %1 : vector<3x1620xf32>
    %48 = arith.addf %45, %47 : vector<3x1620xf32>
    %c0_16 = arith.constant 0 : index
    %c8320 = arith.constant 8320 : index
    %49 = vector.load %arg5[%c0_16, %c8320] : memref<3x9984xf32, #tpu.memory_space<vmem>>, vector<3x1620xf32>
    tpu.vector_store %arg5[%c0_16, %c8320], %48 {strides = array<i32>} : memref<3x9984xf32, #tpu.memory_space<vmem>>, vector<3x1620xf32>,
    return
  }
  func.func @transform_0(%arg0: i32) -> i32 {
    %c0_i32 = arith.constant 0 : i32
    %c0_i32_0 = arith.constant 0 : i32
    return %c0_i32 : i32
  }
  func.func @transform_1(%arg0: i32) -> i32 {
    %c0_i32 = arith.constant 0 : i32
    %c0_i32_0 = arith.constant 0 : i32
    return %c0_i32 : i32
  }
  func.func @transform_2(%arg0: i32) -> (i32, i32) {
    %c0_i32 = arith.constant 0 : i32
    %c0_i32_0 = arith.constant 0 : i32
    return %arg0, %c0_i32 : i32, i32
  }
  func.func @transform_3(%arg0: i32) -> (i32, i32) {
    %c0_i32 = arith.constant 0 : i32
    %c0_i32_0 = arith.constant 0 : i32
    return %arg0, %c0_i32 : i32, i32
  }
  func.func @transform_4(%arg0: i32) -> (i32, i32) {
    %c0_i32 = arith.constant 0 : i32
    %c0_i32_0 = arith.constant 0 : i32
    return %arg0, %c0_i32 : i32, i32
  }
}

</mosaic_0001>

<bundles_post_ra>
// kernel: tpu_custom_call.1
= control target key start
LH: loop header
LB: loop body
LE: loop exit
PB: predicated region body
PF: predicated region fallthrough
CT: control target
= control target key end

     0   :  { %9 = vsyncpa [#allocation5], 0  ;;  %s632_s0 = inlined_call_operand.hbm [shape: f32[6], index: 0, kind: input, shape index: {}]   ;;  %s633_s1 = inlined_call_operand.vmem [shape: f32[6], index: 1, kind: input, shape index: {}]   ;;  %s634_s2 = inlined_call_operand.hbm [shape: f32[3,1620], index: 2, kind: input, shape index: {}]   ;;  %s635_s3 = inlined_call_operand.hbm [shape: f32[3,1620], index: 3, kind: input, shape index: {}]   ;;  %s636_s4 = inlined_call_operand.hbm [shape: f32[3,9984], index: 4, kind: output, shape index: {}]  }
   0x1   :  { %10 = vsyncpa [#allocation6], 0 }
   0x2   :  { %11 = vsyncpa [#allocation3], 0 }
   0x3   :  { %12 = vsyncpa [#allocation10], 0 }
   0x4   :  { %13 = vsyncpa [#allocation4], 0  ;;  %s28_s17 = sshll.u32 %s633_s1, 4  ;;  %s305_s20 = scalar_lea.hbm %s632_s0, 16  ;;  %s29_s17 = int_to_ptr.vmem [resolvable:$true] %s28_s17 }
   0x5   :  { %p306_p0 = scmp.ne.s32.totalorder %s632_s0, %s305_s20  ;;  %p309_p1 = scmp.lt.u32.totalorder %s305_s20, %s632_s0 }
   0x7   :  { %p311_p2 = pnand %p309_p1, %p306_p0 }
   0x9   :  { %314 = shalt.err (!%p311_p2)
}
   0xa   :  { %s403_s25 = smov [#allocation2]   ;;  %s315_s1 = scalar_lea.vmem %s29_s17, 16 }
   0xb   :  { %21 = dma.hbm_to_smem %s632_s0, 16, %s403_s25, [#allocation5]  }
   0xc   :  { %p316_p3 = scmp.ne.s32.totalorder %s29_s17, %s315_s1  ;;  %p320_p4 = scmp.lt.s32.totalorder %s29_s17, %s29_s17 }
   0xd   :  { %p321_p5 = scmp.lt.s32.totalorder %s315_s1, %s315_s1 }
   0xf   :  { %p322_p6 = por %p321_p5, %p320_p4 }
  0x11   :  { %p323_p7 = pnand %p322_p6, %p316_p3 }
  0x13   :  { %326 = shalt.err (!%p323_p7)
}
  0x14   :  { %s404_s28 = smov [#allocation7]   ;;  %s405_s29 = smov [#allocation8]  }
  0x15   :  { %31 = dma.vmem_to_smem %s29_s17, 16, %s404_s28, [#allocation6]  }
  0x16   :  { %s38_s30 = sshll.u32 %s405_s29, 4  ;;  %s406_s5 = smov [#allocation9]   ;;  %s39_s30 = int_to_ptr.vmem [resolvable:$true] %s38_s30 }
  0x17   :  { %s48_s6 = sshll.u32 %s406_s5, 4  ;;  %s327_s0 = scalar_lea.hbm %s634_s2, 832  ;;  %s49_s6 = int_to_ptr.vmem [resolvable:$true] %s48_s6 }
  0x18   :  { %p328_p8 = scmp.ne.s32.totalorder %s634_s2, %s327_s0  ;;  %p331_p9 = scmp.lt.u32.totalorder %s327_s0, %s634_s2 }
  0x1a   :  { %p333_p10 = pnand %p331_p9, %p328_p8 }
  0x1c   :  { %336 = shalt.err (!%p333_p10)
}
  0x1d   :  { %s337_s13 = scalar_lea.vmem %s39_s30, 832  ;;  %p342_p12 = scmp.lt.s32.totalorder %s39_s30, %s39_s30 }
  0x1e   :  { %p338_p11 = scmp.ne.s32.totalorder %s39_s30, %s337_s13  ;;  %p343_p13 = scmp.lt.s32.totalorder %s337_s13, %s337_s13 }
  0x20   :  { %p344_p0 = por %p343_p13, %p342_p12 }
  0x22   :  { %p345_p1 = pnand %p344_p0, %p338_p11 }
  0x24   :  { %348 = shalt.err (!%p345_p1)
}
  0x25   :  { %41 = dma.hbm_to_vmem [thread:$0]  %s634_s2, 832, %s39_s30, [#allocation3]  }
  0x26   :  { %s349_s18 = scalar_lea.hbm %s635_s3, 832 }
  0x27   :  { %p350_p2 = scmp.ne.s32.totalorder %s635_s3, %s349_s18  ;;  %p353_p3 = scmp.lt.u32.totalorder %s349_s18, %s635_s3 }
  0x29   :  { %p355_p4 = pnand %p353_p3, %p350_p2 }
  0x2b   :  { %358 = shalt.err (!%p355_p4)
}
  0x2c   :  { %s359_s23 = scalar_lea.vmem %s49_s6, 832  ;;  %p364_p6 = scmp.lt.s32.totalorder %s49_s6, %s49_s6 }
  0x2d   :  { %p360_p5 = scmp.ne.s32.totalorder %s49_s6, %s359_s23  ;;  %p365_p7 = scmp.lt.s32.totalorder %s359_s23, %s359_s23 }
  0x2f   :  { %p366_p8 = por %p365_p7, %p364_p6 }
  0x31   :  { %p367_p9 = pnand %p366_p8, %p360_p5 }
  0x33   :  { %370 = shalt.err (!%p367_p9)
}
  0x34   :  { %51 = dma.hbm_to_vmem [thread:$0]  %s635_s3, 832, %s49_s6, [#allocation10]  }
  0x35   :  { %393 = dma.done.wait [#allocation5], 16  }
  0x36   :  { %394 = vsyncadd [#allocation5], 4294967280 }
  0x37   :  { %395 = dma.done.wait [#allocation6], 16  }
  0x38   :  { %396 = vsyncadd [#allocation6], 4294967280 }
  0x39   :  { %397 = dma.done.wait [#allocation3], 832  }
  0x3a   :  { %398 = vsyncadd [#allocation3], 4294966464 }
  0x3b   :  { %399 = dma.done.wait [#allocation10], 832  }
  0x3c   :  { %400 = vsyncadd [#allocation10], 4294966464 }
  0x3d   :  { %64 = sfence }
  0x3e   :  { %s79_s25 = sld [smem:[#allocation2]]  ;;  %v472_v0 = vld [vmem:[#allocation8] sm:$0x77]  ;;  %v474_v1 = vld [vmem:[#allocation8 + $0x8] sm:$0x77]  ;;  %s494_s3 = sld [smem:[#allocation2 + $0x1]] }
  0x3f   :  { %s80_s26 = sld [smem:[#allocation7]]  ;;  %v476_v2 = vld [vmem:[#allocation9] sm:$0x77]  ;;  %v478_v3 = vld [vmem:[#allocation9 + $0x8] sm:$0x77]  ;;  %vm110_vm0 = vcmask 681984  }
  0x40   :  { %v480_v4 = vld [vmem:[#allocation8 + $0x10] sm:$0x77]  ;;  %v482_v5 = vld [vmem:[#allocation9 + $0x10] sm:$0x77]  ;;  %v484_v6 = vld [vmem:[#allocation8 + $0x18] sm:$0x77] }
  0x41   :  { %v486_v7 = vld [vmem:[#allocation9 + $0x18] sm:$0x77]  ;;  %v488_v8 = vld [vmem:[#allocation8 + $0x20] sm:$0x77]  ;;  %v490_v9 = vld [vmem:[#allocation9 + $0x20] sm:$0x77] }
  0x42   :  { %v492_v10 = vld [vmem:[#allocation8 + $0x28] sm:$0x77]  ;;  %s496_s27 = sld [smem:[#allocation7 + $0x1]]  ;;  %s498_s1 = sld [smem:[#allocation2 + $0x2]]  ;;  %v503_v16 = vld [vmem:[#allocation9 + $0x28] sm:$0x77] }
  0x43   :  { %v509_v21 = vld [vmem:[#allocation8 + $0x30] sm:$0x7]  ;;  %v511_v22 = vld [vmem:[#allocation9 + $0x30] sm:$0x7]  ;;  %s518_s28 = sld [smem:[#allocation7 + $0x2]]  ;;  %s536_s29 = sld [smem:[#allocation2 + $0x3]] }
  0x44   :  { %v81_v11 = vstv %s79_s25  ;;  %v114_v36 = vstv %s494_s3  ;;  %s538_s30 = sld [smem:[#allocation7 + $0x3]]  ;;  %s554_s5 = sld [smem:[#allocation2 + $0x4]] }
  0x45   :  { %v82_v12 = vmul.f32 %v81_v11, %v472_v0  ;;  %v89_v13 = vstv %s80_s26  ;;  %v83_v14 = vmul.f32 %v81_v11, %v474_v1  ;;  %v84_v15 = vmul.f32 %v81_v11, %v480_v4  ;;  %s559_s6 = sld [smem:[#allocation7 + $0x4]]  ;;  %s561_s7 = sld [smem:[#allocation2 + $0x5]] }
  0x46   :  { %v90_v17 = vmul.f32 %v89_v13, %v476_v2  ;;  %v91_v18 = vmul.f32 %v89_v13, %v478_v3  ;;  %v92_v19 = vmul.f32 %v89_v13, %v482_v5  ;;  %v85_v20 = vmul.f32 %v81_v11, %v484_v6  ;;  %s580_s8 = sld [smem:[#allocation7 + $0x5]]  ;;  %s407_s0 = smov [#allocation11]  }
  0x47   :  { %v93_v23 = vmul.f32 %v89_v13, %v486_v7  ;;  %v86_v24 = vmul.f32 %v81_v11, %v488_v8  ;;  %v94_v25 = vmul.f32 %v89_v13, %v490_v9  ;;  %v87_v26 = vmul.f32 %v81_v11, %v492_v10  ;;  %s278_s9 = sshll.u32 %s407_s0, 4  ;;  %s279_s9 = int_to_ptr.vmem [resolvable:$true] %s278_s9 }
  0x48   :  { %v97_v27 = vadd.f32 %v90_v17, %v82_v12  ;;  %v98_v28 = vadd.f32 %v91_v18, %v83_v14  ;;  %v99_v29 = vadd.f32 %v92_v19, %v84_v15  ;;  %v95_v30 = vmul.f32 %v89_v13, %v503_v16  ;;  %s371_s10 = scalar_lea.vmem %s279_s9, 4992  ;;  %p376_p11 = scmp.lt.s32.totalorder %s279_s9, %s279_s9 }
  0x49   :  { %v100_v31 = vadd.f32 %v93_v23, %v85_v20  ;;  %v101_v32 = vadd.f32 %v94_v25, %v86_v24  ;;  %v88_v33 = vmul.f32 %v81_v11, %v509_v21  ;;  %v96_v34 = vmul.f32 %v89_v13, %v511_v22  ;;  %p372_p10 = scmp.ne.s32.totalorder %s279_s9, %s371_s10  ;;  %p377_p12 = scmp.lt.s32.totalorder %s371_s10, %s371_s10 }
  0x4a   :  { %104 = vst [vmem:[#allocation11] sm:$0x77] %v97_v27  ;;  %105 = vst [vmem:[#allocation11 + $0x8] sm:$0x77] %v98_v28  ;;  %v102_v35 = vadd.f32 %v95_v30, %v87_v26  ;;  %v122_v37 = vstv %s496_s27  ;;  %v146_v38 = vstv %s498_s1  ;;  %v115_v40 = vmul.f32 %v114_v36, %v472_v0 }
  0x4b   :  { %106 = vst [vmem:[#allocation11 + $0x10] sm:$0x77] %v99_v29  ;;  %107 = vst [vmem:[#allocation11 + $0x18] sm:$0x77] %v100_v31  ;;  %v103_v39 = vadd.f32 %v96_v34, %v88_v33  ;;  %v123_v41 = vmul.f32 %v122_v37, %v476_v2  ;;  %v116_v42 = vmul.f32 %v114_v36, %v474_v1  ;;  %v154_v61 = vstv %s518_s28  ;;  %p378_p13 = por %p377_p12, %p376_p11 }
  0x4c   :  { %108 = vst [vmem:[#allocation11 + $0x20] sm:$0x77] %v101_v32  ;;  %109 = vst [vmem:[#allocation11 + $0x28] sm:$0x77] %v102_v35  ;;  %v124_v43 = vmul.f32 %v122_v37, %v478_v3  ;;  %v117_v44 = vmul.f32 %v114_v36, %v480_v4  ;;  %v125_v45 = vmul.f32 %v122_v37, %v482_v5  ;;  %v178_v31 = vstv %s536_s29 }
  0x4d   :  { %v118_v46 = vmul.f32 %v114_v36, %v484_v6  ;;  %111 = vst.msk [vmem:[#allocation11 + $0x30] sm:$0x7] %vm110_vm0, %v103_v39  ;;  %v130_v47 = vadd.f32 %v123_v41, %v115_v40  ;;  %v126_v48 = vmul.f32 %v122_v37, %v486_v7  ;;  %v119_v49 = vmul.f32 %v114_v36, %v488_v8  ;;  %p379_p0 = pnand %p378_p13, %p372_p10 }
  0x4e   :  { %v127_v50 = vmul.f32 %v122_v37, %v490_v9  ;;  %v131_v51 = vadd.f32 %v124_v43, %v116_v42  ;;  %v132_v52 = vadd.f32 %v125_v45, %v117_v44  ;;  %v120_v53 = vmul.f32 %v114_v36, %v492_v10 }
  0x4f   :  { %v128_v54 = vmul.f32 %v122_v37, %v503_v16  ;;  %137 = vst [vmem:[#allocation11 + $0x34] sm:$0x77] %v130_v47  ;;  %v133_v55 = vadd.f32 %v126_v48, %v118_v46  ;;  %v121_v57 = vmul.f32 %v114_v36, %v509_v21  ;;  %v129_v58 = vmul.f32 %v122_v37, %v511_v22 }
  0x50   :  { %v134_v56 = vadd.f32 %v127_v50, %v119_v49  ;;  %138 = vst [vmem:[#allocation11 + $0x3c] sm:$0x77] %v131_v51  ;;  %139 = vst [vmem:[#allocation11 + $0x44] sm:$0x77] %v132_v52  ;;  %v147_v60 = vmul.f32 %v146_v38, %v472_v0  ;;  %v148_v62 = vmul.f32 %v146_v38, %v474_v1  ;;  %v186_v32 = vstv %s538_s30 }
  0x51   :  { %v135_v59 = vadd.f32 %v128_v54, %v120_v53  ;;  %140 = vst [vmem:[#allocation11 + $0x4c] sm:$0x77] %v133_v55  ;;  %v136_v63 = vadd.f32 %v129_v58, %v121_v57  ;;  %v155_v11 = vmul.f32 %v154_v61, %v476_v2  ;;  %v156_v12 = vmul.f32 %v154_v61, %v478_v3 }
  0x52   :  { %141 = vst [vmem:[#allocation11 + $0x54] sm:$0x77] %v134_v56  ;;  %v149_v13 = vmul.f32 %v146_v38, %v480_v4  ;;  %v157_v14 = vmul.f32 %v154_v61, %v482_v5  ;;  %v150_v15 = vmul.f32 %v146_v38, %v484_v6  ;;  %v158_v17 = vmul.f32 %v154_v61, %v486_v7 }
  0x53   :  { %142 = vst [vmem:[#allocation11 + $0x5c] sm:$0x77] %v135_v59  ;;  %v151_v18 = vmul.f32 %v146_v38, %v488_v8  ;;  %143 = vst.msk [vmem:[#allocation11 + $0x64] sm:$0x7] %vm110_vm0, %v136_v63  ;;  %v162_v19 = vadd.f32 %v155_v11, %v147_v60  ;;  %v163_v20 = vadd.f32 %v156_v12, %v148_v62  ;;  %v210_v54 = vstv %s554_s5 }
  0x54   :  { %v159_v23 = vmul.f32 %v154_v61, %v490_v9  ;;  %v152_v24 = vmul.f32 %v146_v38, %v492_v10  ;;  %v164_v25 = vadd.f32 %v157_v14, %v149_v13  ;;  %v165_v26 = vadd.f32 %v158_v17, %v150_v15 }
  0x55   :  { %v160_v27 = vmul.f32 %v154_v61, %v503_v16  ;;  %v153_v28 = vmul.f32 %v146_v38, %v509_v21  ;;  %169 = vst [vmem:[#allocation11 + $0x68] sm:$0x77] %v162_v19  ;;  %170 = vst [vmem:[#allocation11 + $0x70] sm:$0x77] %v163_v20  ;;  %v161_v30 = vmul.f32 %v154_v61, %v511_v22  ;;  %v218_v55 = vstv %s559_s6 }
  0x56   :  { %v166_v29 = vadd.f32 %v159_v23, %v151_v18  ;;  %171 = vst [vmem:[#allocation11 + $0x78] sm:$0x77] %v164_v25  ;;  %172 = vst [vmem:[#allocation11 + $0x80] sm:$0x77] %v165_v26  ;;  %v179_v34 = vmul.f32 %v178_v31, %v472_v0  ;;  %v187_v35 = vmul.f32 %v186_v32, %v476_v2  ;;  %v242_v56 = vstv %s561_s7 }
  0x57   :  { %v167_v33 = vadd.f32 %v160_v27, %v152_v24  ;;  %v180_v36 = vmul.f32 %v178_v31, %v474_v1  ;;  %v168_v37 = vadd.f32 %v161_v30, %v153_v28  ;;  %v188_v38 = vmul.f32 %v186_v32, %v478_v3 }
  0x58   :  { %173 = vst [vmem:[#allocation11 + $0x88] sm:$0x77] %v166_v29  ;;  %v181_v39 = vmul.f32 %v178_v31, %v480_v4  ;;  %v189_v40 = vmul.f32 %v186_v32, %v482_v5  ;;  %v194_v41 = vadd.f32 %v187_v35, %v179_v34  ;;  %v182_v42 = vmul.f32 %v178_v31, %v484_v6 }
  0x59   :  { %174 = vst [vmem:[#allocation11 + $0x90] sm:$0x77] %v167_v33  ;;  %v190_v43 = vmul.f32 %v186_v32, %v486_v7  ;;  %v183_v44 = vmul.f32 %v178_v31, %v488_v8  ;;  %175 = vst.msk [vmem:[#allocation11 + $0x98] sm:$0x7] %vm110_vm0, %v168_v37  ;;  %v195_v45 = vadd.f32 %v188_v38, %v180_v36  ;;  %v250_v29 = vstv %s580_s8 }
  0x5a   :  { %v196_v46 = vadd.f32 %v189_v40, %v181_v39  ;;  %v191_v47 = vmul.f32 %v186_v32, %v490_v9  ;;  %v184_v48 = vmul.f32 %v178_v31, %v492_v10  ;;  %201 = vst [vmem:[#allocation11 + $0x9c] sm:$0x77] %v194_v41  ;;  %v192_v50 = vmul.f32 %v186_v32, %v503_v16 }
  0x5b   :  { %v197_v49 = vadd.f32 %v190_v43, %v182_v42  ;;  %v185_v51 = vmul.f32 %v178_v31, %v509_v21  ;;  %v193_v52 = vmul.f32 %v186_v32, %v511_v22  ;;  %202 = vst [vmem:[#allocation11 + $0xa4] sm:$0x77] %v195_v45  ;;  %v211_v59 = vmul.f32 %v210_v54, %v472_v0 }
  0x5c   :  { %203 = vst [vmem:[#allocation11 + $0xac] sm:$0x77] %v196_v46  ;;  %v198_v53 = vadd.f32 %v191_v47, %v183_v44  ;;  %v199_v57 = vadd.f32 %v192_v50, %v184_v48  ;;  %v219_v60 = vmul.f32 %v218_v55, %v476_v2  ;;  %v212_v61 = vmul.f32 %v210_v54, %v474_v1 }
  0x5d   :  { %204 = vst [vmem:[#allocation11 + $0xb4] sm:$0x77] %v197_v49  ;;  %v200_v58 = vadd.f32 %v193_v52, %v185_v51  ;;  %v220_v62 = vmul.f32 %v218_v55, %v478_v3  ;;  %v213_v63 = vmul.f32 %v210_v54, %v480_v4  ;;  %v221_v11 = vmul.f32 %v218_v55, %v482_v5 }
  0x5e   :  { %205 = vst [vmem:[#allocation11 + $0xbc] sm:$0x77] %v198_v53  ;;  %206 = vst [vmem:[#allocation11 + $0xc4] sm:$0x77] %v199_v57  ;;  %v226_v12 = vadd.f32 %v219_v60, %v211_v59  ;;  %v214_v13 = vmul.f32 %v210_v54, %v484_v6  ;;  %v222_v14 = vmul.f32 %v218_v55, %v486_v7 }
  0x5f   :  { %207 = vst.msk [vmem:[#allocation11 + $0xcc] sm:$0x7] %vm110_vm0, %v200_v58  ;;  %v215_v15 = vmul.f32 %v210_v54, %v488_v8  ;;  %v227_v17 = vadd.f32 %v220_v62, %v212_v61  ;;  %v228_v18 = vadd.f32 %v221_v11, %v213_v63  ;;  %v223_v19 = vmul.f32 %v218_v55, %v490_v9 }
  0x60   :  { %v216_v20 = vmul.f32 %v210_v54, %v492_v10  ;;  %233 = vst [vmem:[#allocation11 + $0xd0] sm:$0x77] %v226_v12  ;;  %v229_v23 = vadd.f32 %v222_v14, %v214_v13  ;;  %v224_v24 = vmul.f32 %v218_v55, %v503_v16  ;;  %v217_v25 = vmul.f32 %v210_v54, %v509_v21 }
  0x61   :  { %v225_v26 = vmul.f32 %v218_v55, %v511_v22  ;;  %234 = vst [vmem:[#allocation11 + $0xd8] sm:$0x77] %v227_v17  ;;  %235 = vst [vmem:[#allocation11 + $0xe0] sm:$0x77] %v228_v18  ;;  %v230_v27 = vadd.f32 %v223_v19, %v215_v15  ;;  %v243_v28 = vmul.f32 %v242_v56, %v472_v0 }
  0x62   :  { %v244_v30 = vmul.f32 %v242_v56, %v474_v1  ;;  %236 = vst [vmem:[#allocation11 + $0xe8] sm:$0x77] %v229_v23  ;;  %v231_v31 = vadd.f32 %v224_v24, %v216_v20  ;;  %v251_v33 = vmul.f32 %v250_v29, %v476_v2  ;;  %v252_v34 = vmul.f32 %v250_v29, %v478_v3 }
  0x63   :  { %v232_v32 = vadd.f32 %v225_v26, %v217_v25  ;;  %237 = vst [vmem:[#allocation11 + $0xf0] sm:$0x77] %v230_v27  ;;  %v245_v35 = vmul.f32 %v242_v56, %v480_v4  ;;  %v253_v36 = vmul.f32 %v250_v29, %v482_v5  ;;  %v246_v37 = vmul.f32 %v242_v56, %v484_v6 }
  0x64   :  { %v254_v38 = vmul.f32 %v250_v29, %v486_v7  ;;  %238 = vst [vmem:[#allocation11 + $0xf8] sm:$0x77] %v231_v31  ;;  %v258_v0 = vadd.f32 %v251_v33, %v243_v28  ;;  %v259_v1 = vadd.f32 %v252_v34, %v244_v30  ;;  %v247_v39 = vmul.f32 %v242_v56, %v488_v8 }
  0x65   :  { %239 = vst.msk [vmem:[#allocation11 + $0x100] sm:$0x7] %vm110_vm0, %v232_v32  ;;  %v255_v2 = vmul.f32 %v250_v29, %v490_v9  ;;  %v260_v40 = vadd.f32 %v253_v36, %v245_v35  ;;  %v248_v41 = vmul.f32 %v242_v56, %v492_v10  ;;  %v256_v4 = vmul.f32 %v250_v29, %v503_v16 }
  0x66   :  { %v261_v3 = vadd.f32 %v254_v38, %v246_v37  ;;  %265 = vst [vmem:[#allocation11 + $0x104] sm:$0x77] %v258_v0  ;;  %266 = vst [vmem:[#allocation11 + $0x10c] sm:$0x77] %v259_v1  ;;  %v249_v6 = vmul.f32 %v242_v56, %v509_v21  ;;  %v257_v7 = vmul.f32 %v250_v29, %v511_v22 }
  0x67   :  { %v262_v5 = vadd.f32 %v255_v2, %v247_v39  ;;  %267 = vst [vmem:[#allocation11 + $0x114] sm:$0x77] %v260_v40  ;;  %v263_v8 = vadd.f32 %v256_v4, %v248_v41 }
  0x68   :  { %268 = vst [vmem:[#allocation11 + $0x11c] sm:$0x77] %v261_v3  ;;  %v264_v9 = vadd.f32 %v257_v7, %v249_v6 }
  0x69   :  { %269 = vst [vmem:[#allocation11 + $0x124] sm:$0x77] %v262_v5  ;;  %270 = vst [vmem:[#allocation11 + $0x12c] sm:$0x77] %v263_v8 }
  0x6a   :  { %271 = vst.msk [vmem:[#allocation11 + $0x134] sm:$0x7] %vm110_vm0, %v264_v9 }
  0x6b   :  { %382 = shalt.err (!%p379_p0)
}
  0x6c   :  { %s383_s13 = scalar_lea.hbm %s636_s4, 4992 }
  0x6d   :  { %p384_p1 = scmp.ne.s32.totalorder %s636_s4, %s383_s13  ;;  %p387_p2 = scmp.lt.u32.totalorder %s383_s13, %s636_s4 }
  0x6f   :  { %p389_p3 = pnand %p387_p2, %p384_p1 }
  0x71   :  { %392 = shalt.err (!%p389_p3)
}
  0x72   :  { %281 = dma.vmem_to_hbm [thread:$0]  %s279_s9, 4992, %s636_s4, [#allocation4]  }
  0x73   :  { %401 = dma.done.wait [#allocation4], 4992  }
  0x74   :  { %402 = vsyncadd [#allocation4], 4294962304 }
  0x75   :  { %285 = vsyncpa [#allocation3], 1 }
  0x76   :  { %286 = vsyncpa [#allocation10], 1 }
  0x77   :  { %287 = vsyncpa [#allocation4], 1 }
  0x78   :  { %288 = vsyncpa [#allocation5], 1 }
  0x79   :  { %289 = vsyncpa [#allocation6], 1 }

</bundles_post_ra>
